<compile_context>
chip_gen: v5e
topology: v5e:2x2
jax: 0.10.0
libtpu: 0.0.40
codegen_flags: <defaults>
</compile_context>

<pallas_src>
import functools

import jax
import jax.numpy as jnp
from jax.experimental import pallas as pl
from jax.experimental.pallas import tpu as pltpu


# ----------------------------------------------------------------------------
# Kernel
# ----------------------------------------------------------------------------
def _make_qzyx_kernel(num_hidden_layers: int, latent_dim: int):
    """Kernel for a fixed number of (Linear + BN + PReLU) blocks.

    Input ref order:
      x, y, W_x, W_y, gb_0, a_0, [w_i, gb_i, a_i for i=1..L-1], w_heads, b_heads, eps
    Output ref: packed (B, 3*latent) = [z | mu | logsigma].
    """

    def kernel(*refs):
        in_refs = refs[:-1]
        out_ref = refs[-1]

        x = in_refs[0][...]                       # (B, input_dim)
        y = in_refs[1][...]                       # (B, n_classes)
        w_x = in_refs[2][...]                     # (input_dim, d0)
        w_y = in_refs[3][...]                     # (n_classes, d0)
        idx = 4

        def bn_prelu(h, gb_ref, a_ref):
            # BatchNorm1d (training mode) folded to scale/shift; one-pass stats.
            gamma = gb_ref[0:1, :]                # (1, d)
            beta = gb_ref[1:2, :]                 # (1, d)
            a = a_ref[0]                          # scalar PReLU slope (SMEM)
            inv_b = 1.0 / h.shape[0]
            s = jnp.sum(h, axis=0, keepdims=True)
            ss = jnp.sum(h * h, axis=0, keepdims=True)
            mean = s * inv_b
            var = ss * inv_b - mean * mean        # biased variance (f32)
            scale = gamma * jax.lax.rsqrt(var + 1e-5)
            shift = beta - mean * scale
            h = h * scale + shift
            return jnp.where(h >= 0.0, h, a * h)  # PReLU (shared slope)

        # First hidden layer: fused x@W_x + y@W_y (no concat), bias dropped
        # (exactly cancelled by the BN batch-mean subtraction).
        h = (jnp.dot(x, w_x, preferred_element_type=jnp.float32)
             + jnp.dot(y, w_y, preferred_element_type=jnp.float32))
        h = bn_prelu(h, in_refs[idx], in_refs[idx + 1])
        idx += 2

        for _ in range(num_hidden_layers - 1):
            w = in_refs[idx][...]                 # (d_in, d_out)
            h = jnp.dot(h, w, preferred_element_type=jnp.float32)
            h = bn_prelu(h, in_refs[idx + 1], in_refs[idx + 2])
            idx += 3

        w_heads = in_refs[idx][...]               # (d_h, 2*latent) = [W_mu | W_ls]
        b_heads = in_refs[idx + 1][...]           # (1, 2*latent)
        eps = in_refs[idx + 2][...]               # (B, latent)

        # One fused MXU push for both heads.
        heads = jnp.dot(h, w_heads, preferred_element_type=jnp.float32) + b_heads
        mu = heads[:, :latent_dim]
        logsigma = heads[:, latent_dim:]

        # reparameterize: z = eps * exp(0.5 * logsigma) + mu
        z = eps * jnp.exp(0.5 * logsigma) + mu

        # Single packed store: [z | mu | logsigma].
        out_ref[...] = jnp.concatenate([z, mu, logsigma], axis=1)

    return kernel


# ----------------------------------------------------------------------------
# Wrapper
# ----------------------------------------------------------------------------
@functools.partial(jax.jit, static_argnames=("latent_dim", "num_hidden_layers"))
def qzyx_forward(x, y, flat_params, eps, *, latent_dim, num_hidden_layers):
    """Full QZYXNetwork forward in one Pallas call.

    x: (B, input_dim) f32, y: (B, n_classes) f32, eps: (B, latent_dim) f32.
    flat_params: output of pack_params().
    Returns (z, mu, logsigma), each (B, latent_dim) f32.
    """
    inputs = [x, y] + list(flat_params) + [eps]
    batch = x.shape[0]

    vmem = pl.BlockSpec(memory_space=pltpu.MemorySpace.VMEM)
    smem = pl.BlockSpec(memory_space=pltpu.MemorySpace.SMEM)

    # x, y, W_x, W_y, gb_0 in VMEM; PReLU slope a_0 in SMEM.
    in_specs = [vmem, vmem, vmem, vmem, vmem, smem]
    for _ in range(num_hidden_layers - 1):
        in_specs += [vmem, vmem, smem]            # w_i, gb_i, a_i
    in_specs += [vmem, vmem, vmem]                # w_heads, b_heads, eps
    assert len(in_specs) == len(inputs)

    kernel = _make_qzyx_kernel(num_hidden_layers, latent_dim)
    packed = pl.pallas_call(
        kernel,
        out_shape=jax.ShapeDtypeStruct((batch, 3 * latent_dim), jnp.float32),
        in_specs=in_specs,
        out_specs=vmem,
        compiler_params=pltpu.CompilerParams(vmem_limit_bytes=32 << 20),
    )(*inputs)

    z = packed[:, :latent_dim]
    mu = packed[:, latent_dim:2 * latent_dim]
    logsigma = packed[:, 2 * latent_dim:]
    return z, mu, logsigma


# ----------------------------------------------------------------------------
# Deterministic parameter construction + kernel-layout packing
# ----------------------------------------------------------------------------
def init_params(key, input_dim, hidden_dims, n_components, latent_dim):
    """Raw PyTorch-style params: per layer (w, b, gamma, beta, a), then heads."""
    dims = [input_dim + n_components] + list(hidden_dims)
    raw = []
    for i in range(len(hidden_dims)):
        key, kw, kb, kg, kbt = jax.random.split(key, 5)
        d_in, d_out = dims[i], dims[i + 1]
        w = jax.random.normal(kw, (d_in, d_out), jnp.float32) * 0.1
        b = jax.random.normal(kb, (1, d_out), jnp.float32) * 0.05
        gamma = 1.0 + jax.random.normal(kg, (1, d_out), jnp.float32) * 0.05
        beta = jax.random.normal(kbt, (1, d_out), jnp.float32) * 0.05
        a = jnp.full((1, 1), 0.25, jnp.float32)   # PReLU default init
        raw += [w, b, gamma, beta, a]

    key, kmu, kls, kbm, kbl = jax.random.split(key, 5)
    d_h = hidden_dims[-1]
    raw += [
        jax.random.normal(kmu, (d_h, latent_dim), jnp.float32) * 0.1,
        jax.random.normal(kbm, (1, latent_dim), jnp.float32) * 0.05,
        jax.random.normal(kls, (d_h, latent_dim), jnp.float32) * 0.1,
        jax.random.normal(kbl, (1, latent_dim), jnp.float32) * 0.05,
    ]
    return raw


def pack_params(raw, input_dim, hidden_dims, n_components, latent_dim):
    """Repack raw params into the collapsed layout the kernel consumes.

    [W_x, W_y, gb_0, a_0, (w_i, gb_i, a_i)_{i>=1}, w_heads, b_heads]
    Hidden-layer Linear biases are dropped (cancelled exactly by training-mode BN).
    """
    num_layers = len(hidden_dims)
    flat = []

    w0, _b0, g0, bt0, a0 = raw[0:5]
    flat += [
        w0[:input_dim, :],                          # W_x
        w0[input_dim:, :],                          # W_y
        jnp.concatenate([g0, bt0], axis=0),         # (2, d0) gamma/beta
        a0.reshape((1,)),                           # PReLU slope -> SMEM scalar
    ]
    for i in range(1, num_layers):
        w, _b, g, bt, a = raw[5 * i:5 * i + 5]
        flat += [w, jnp.concatenate([g, bt], axis=0), a.reshape((1,))]

    w_mu, b_mu, w_ls, b_ls = raw[5 * num_layers:5 * num_layers + 4]
    flat += [
        jnp.concatenate([w_mu, w_ls], axis=1),      # (d_h, 2*latent)
        jnp.concatenate([b_mu, b_ls], axis=1),      # (1, 2*latent)
    ]
    return flat


# ----------------------------------------------------------------------------
# Pure-JAX reference (unfused, with biases) for a sanity check
# ----------------------------------------------------------------------------
def reference_forward(x, y, raw_params, eps, hidden_dims):
    h = jnp.concatenate([x, y], axis=1)
    idx = 0
    for _ in range(len(hidden_dims)):
        w, b, g, bt, a = raw_params[idx:idx + 5]
        idx += 5
        h = h @ w + b
        m = jnp.mean(h, axis=0, keepdims=True)
        v = jnp.mean((h - m) ** 2, axis=0, keepdims=True)
        h = g * (h - m) / jnp.sqrt(v + 1e-5) + bt
        h = jnp.where(h >= 0.0, h, a * h)
    w_mu, b_mu, w_ls, b_ls = raw_params[idx:idx + 4]
    mu = h @ w_mu + b_mu
    ls = h @ w_ls + b_ls
    z = eps * jnp.exp(0.5 * ls) + mu
    return z, mu, ls


# ----------------------------------------------------------------------------
if __name__ == "__main__":
    batch = 8
    input_dim = 16
    n_components = 4
    hidden_dims = [32, 32]
    latent_dim = 8

    root = jax.random.PRNGKey(0)
    k_x, k_y, k_eps, k_params = jax.random.split(root, 4)

    x = jax.random.normal(k_x, (batch, input_dim), jnp.float32)
    y = jax.nn.one_hot(
        jax.random.randint(k_y, (batch,), 0, n_components), n_components
    ).astype(jnp.float32)
    eps = jax.random.normal(k_eps, (batch, latent_dim), jnp.float32)

    raw = init_params(k_params, input_dim, hidden_dims, n_components, latent_dim)
    flat = pack_params(raw, input_dim, hidden_dims, n_components, latent_dim)

    z, mu, logsigma = qzyx_forward(
        x, y, tuple(flat), eps,
        latent_dim=latent_dim, num_hidden_layers=len(hidden_dims),
    )
    jax.block_until_ready((z, mu, logsigma))

    # sanity check vs. pure-JAX reference (with biases, unfused heads)
    z_r, mu_r, ls_r = reference_forward(x, y, raw, eps, hidden_dims)
    assert jnp.allclose(z, z_r, atol=1e-4), "z mismatch"
    assert jnp.allclose(mu, mu_r, atol=1e-4), "mu mismatch"
    assert jnp.allclose(logsigma, ls_r, atol=1e-4), "logsigma mismatch"
    assert z.shape == (batch, latent_dim)

    print("KERNEL_OK")
</pallas_src>

<mosaic_0001>
module attributes {stable_mosaic.version = 11 : i64} {
  func.func @kernel(%arg0: memref<8x16xf32, #tpu.memory_space<vmem>>, %arg1: memref<8x4xf32, #tpu.memory_space<vmem>>, %arg2: memref<16x32xf32, #tpu.memory_space<vmem>>, %arg3: memref<4x32xf32, #tpu.memory_space<vmem>>, %arg4: memref<2x32xf32, #tpu.memory_space<vmem>>, %arg5: memref<1xf32, #tpu.memory_space<smem>>, %arg6: memref<32x32xf32, #tpu.memory_space<vmem>>, %arg7: memref<2x32xf32, #tpu.memory_space<vmem>>, %arg8: memref<1xf32, #tpu.memory_space<smem>>, %arg9: memref<32x16xf32, #tpu.memory_space<vmem>>, %arg10: memref<1x16xf32, #tpu.memory_space<vmem>>, %arg11: memref<8x8xf32, #tpu.memory_space<vmem>>, %arg12: memref<8x24xf32, #tpu.memory_space<vmem>>) attributes {dimension_semantics = [], scalar_prefetch = 0 : i64, scratch_operands = 0 : i64, tpu.core_type = #tpu.core_type<tc>} {
    %c0 = arith.constant 0 : index
    %c0_0 = arith.constant 0 : index
    %0 = vector.load %arg0[%c0, %c0_0] : memref<8x16xf32, #tpu.memory_space<vmem>>, vector<8x16xf32>
    %c0_1 = arith.constant 0 : index
    %c0_2 = arith.constant 0 : index
    %1 = vector.load %arg1[%c0_1, %c0_2] : memref<8x4xf32, #tpu.memory_space<vmem>>, vector<8x4xf32>
    %c0_3 = arith.constant 0 : index
    %c0_4 = arith.constant 0 : index
    %2 = vector.load %arg2[%c0_3, %c0_4] : memref<16x32xf32, #tpu.memory_space<vmem>>, vector<16x32xf32>
    %c0_5 = arith.constant 0 : index
    %c0_6 = arith.constant 0 : index
    %3 = vector.load %arg3[%c0_5, %c0_6] : memref<4x32xf32, #tpu.memory_space<vmem>>, vector<4x32xf32>
    %cst = arith.constant dense<0.000000e+00> : vector<8x32xf32>
    %4 = tpu.matmul %0, %2, %cst {dimension_numbers = #tpu.dot_dimension_numbers<[1], [0], [0], [1], [0, 0, 1, 1], [], []>} : vector<8x16xf32>, vector<16x32xf32>, vector<8x32xf32> -> vector<8x32xf32>
    %cst_7 = arith.constant dense<0.000000e+00> : vector<8x32xf32>
    %5 = tpu.matmul %1, %3, %cst_7 {dimension_numbers = #tpu.dot_dimension_numbers<[1], [0], [0], [1], [0, 0, 1, 1], [], []>} : vector<8x4xf32>, vector<4x32xf32>, vector<8x32xf32> -> vector<8x32xf32>
    %6 = arith.addf %4, %5 : vector<8x32xf32>
    %c0_8 = arith.constant 0 : index
    %c0_9 = arith.constant 0 : index
    %7 = vector.load %arg4[%c0_8, %c0_9] : memref<2x32xf32, #tpu.memory_space<vmem>>, vector<1x32xf32>
    %c1 = arith.constant 1 : index
    %c0_10 = arith.constant 0 : index
    %8 = vector.load %arg4[%c1, %c0_10] : memref<2x32xf32, #tpu.memory_space<vmem>>, vector<1x32xf32>
    %c0_11 = arith.constant 0 : index
    %9 = memref.load %arg5[%c0_11] : memref<1xf32, #tpu.memory_space<smem>>
    %cst_12 = arith.constant dense<0.000000e+00> : vector<32xf32>
    %10 = vector.multi_reduction <add>, %6, %cst_12 [0] : vector<8x32xf32> to vector<32xf32>
    %11 = vector.shape_cast %10 : vector<32xf32> to vector<1x32xf32>
    %12 = arith.mulf %6, %6 : vector<8x32xf32>
    %cst_13 = arith.constant dense<0.000000e+00> : vector<32xf32>
    %13 = vector.multi_reduction <add>, %12, %cst_13 [0] : vector<8x32xf32> to vector<32xf32>
    %14 = vector.shape_cast %13 : vector<32xf32> to vector<1x32xf32>
    %cst_14 = arith.constant 1.250000e-01 : f32
    %15 = vector.broadcast %cst_14 : f32 to vector<1x32xf32>
    %16 = arith.mulf %11, %15 : vector<1x32xf32>
    %cst_15 = arith.constant 1.250000e-01 : f32
    %17 = vector.broadcast %cst_15 : f32 to vector<1x32xf32>
    %18 = arith.mulf %14, %17 : vector<1x32xf32>
    %19 = arith.mulf %16, %16 : vector<1x32xf32>
    %20 = arith.subf %18, %19 : vector<1x32xf32>
    %cst_16 = arith.constant 9.99999974E-6 : f32
    %21 = vector.broadcast %cst_16 : f32 to vector<1x32xf32>
    %22 = arith.addf %20, %21 : vector<1x32xf32>
    %23 = math.rsqrt %22 : vector<1x32xf32>
    %24 = arith.mulf %7, %23 : vector<1x32xf32>
    %25 = arith.mulf %16, %24 : vector<1x32xf32>
    %26 = arith.subf %8, %25 : vector<1x32xf32>
    %27 = vector.broadcast %24 : vector<1x32xf32> to vector<8x32xf32>
    %28 = arith.mulf %6, %27 : vector<8x32xf32>
    %29 = vector.broadcast %26 : vector<1x32xf32> to vector<8x32xf32>
    %30 = arith.addf %28, %29 : vector<8x32xf32>
    %cst_17 = arith.constant 0.000000e+00 : f32
    %31 = vector.broadcast %cst_17 : f32 to vector<8x32xf32>
    %32 = arith.cmpf oge, %30, %31 : vector<8x32xf32>
    %33 = vector.broadcast %9 : f32 to vector<8x32xf32>
    %34 = arith.mulf %33, %30 : vector<8x32xf32>
    %35 = arith.select %32, %30, %34 : vector<8x32xi1>, vector<8x32xf32>
    %c0_18 = arith.constant 0 : index
    %c0_19 = arith.constant 0 : index
    %36 = vector.load %arg6[%c0_18, %c0_19] : memref<32x32xf32, #tpu.memory_space<vmem>>, vector<32x32xf32>
    %cst_20 = arith.constant dense<0.000000e+00> : vector<8x32xf32>
    %37 = tpu.matmul %35, %36, %cst_20 {dimension_numbers = #tpu.dot_dimension_numbers<[1], [0], [0], [1], [0, 0, 1, 1], [], []>} : vector<8x32xf32>, vector<32x32xf32>, vector<8x32xf32> -> vector<8x32xf32>
    %c0_21 = arith.constant 0 : index
    %c0_22 = arith.constant 0 : index
    %38 = vector.load %arg7[%c0_21, %c0_22] : memref<2x32xf32, #tpu.memory_space<vmem>>, vector<1x32xf32>
    %c1_23 = arith.constant 1 : index
    %c0_24 = arith.constant 0 : index
    %39 = vector.load %arg7[%c1_23, %c0_24] : memref<2x32xf32, #tpu.memory_space<vmem>>, vector<1x32xf32>
    %c0_25 = arith.constant 0 : index
    %40 = memref.load %arg8[%c0_25] : memref<1xf32, #tpu.memory_space<smem>>
    %cst_26 = arith.constant dense<0.000000e+00> : vector<32xf32>
    %41 = vector.multi_reduction <add>, %37, %cst_26 [0] : vector<8x32xf32> to vector<32xf32>
    %42 = vector.shape_cast %41 : vector<32xf32> to vector<1x32xf32>
    %43 = arith.mulf %37, %37 : vector<8x32xf32>
    %cst_27 = arith.constant dense<0.000000e+00> : vector<32xf32>
    %44 = vector.multi_reduction <add>, %43, %cst_27 [0] : vector<8x32xf32> to vector<32xf32>
    %45 = vector.shape_cast %44 : vector<32xf32> to vector<1x32xf32>
    %cst_28 = arith.constant 1.250000e-01 : f32
    %46 = vector.broadcast %cst_28 : f32 to vector<1x32xf32>
    %47 = arith.mulf %42, %46 : vector<1x32xf32>
    %cst_29 = arith.constant 1.250000e-01 : f32
    %48 = vector.broadcast %cst_29 : f32 to vector<1x32xf32>
    %49 = arith.mulf %45, %48 : vector<1x32xf32>
    %50 = arith.mulf %47, %47 : vector<1x32xf32>
    %51 = arith.subf %49, %50 : vector<1x32xf32>
    %cst_30 = arith.constant 9.99999974E-6 : f32
    %52 = vector.broadcast %cst_30 : f32 to vector<1x32xf32>
    %53 = arith.addf %51, %52 : vector<1x32xf32>
    %54 = math.rsqrt %53 : vector<1x32xf32>
    %55 = arith.mulf %38, %54 : vector<1x32xf32>
    %56 = arith.mulf %47, %55 : vector<1x32xf32>
    %57 = arith.subf %39, %56 : vector<1x32xf32>
    %58 = vector.broadcast %55 : vector<1x32xf32> to vector<8x32xf32>
    %59 = arith.mulf %37, %58 : vector<8x32xf32>
    %60 = vector.broadcast %57 : vector<1x32xf32> to vector<8x32xf32>
    %61 = arith.addf %59, %60 : vector<8x32xf32>
    %cst_31 = arith.constant 0.000000e+00 : f32
    %62 = vector.broadcast %cst_31 : f32 to vector<8x32xf32>
    %63 = arith.cmpf oge, %61, %62 : vector<8x32xf32>
    %64 = vector.broadcast %40 : f32 to vector<8x32xf32>
    %65 = arith.mulf %64, %61 : vector<8x32xf32>
    %66 = arith.select %63, %61, %65 : vector<8x32xi1>, vector<8x32xf32>
    %c0_32 = arith.constant 0 : index
    %c0_33 = arith.constant 0 : index
    %67 = vector.load %arg9[%c0_32, %c0_33] : memref<32x16xf32, #tpu.memory_space<vmem>>, vector<32x16xf32>
    %c0_34 = arith.constant 0 : index
    %c0_35 = arith.constant 0 : index
    %68 = vector.load %arg10[%c0_34, %c0_35] : memref<1x16xf32, #tpu.memory_space<vmem>>, vector<1x16xf32>
    %c0_36 = arith.constant 0 : index
    %c0_37 = arith.constant 0 : index
    %69 = vector.load %arg11[%c0_36, %c0_37] : memref<8x8xf32, #tpu.memory_space<vmem>>, vector<8x8xf32>
    %cst_38 = arith.constant dense<0.000000e+00> : vector<8x16xf32>
    %70 = tpu.matmul %66, %67, %cst_38 {dimension_numbers = #tpu.dot_dimension_numbers<[1], [0], [0], [1], [0, 0, 1, 1], [], []>} : vector<8x32xf32>, vector<32x16xf32>, vector<8x16xf32> -> vector<8x16xf32>
    %71 = vector.broadcast %68 : vector<1x16xf32> to vector<8x16xf32>
    %72 = arith.addf %70, %71 : vector<8x16xf32>
    %73 = vector.extract_strided_slice %72 {offsets = [0, 0], sizes = [8, 8], strides = [1, 1]} : vector<8x16xf32> to vector<8x8xf32>
    %74 = vector.extract_strided_slice %72 {offsets = [0, 8], sizes = [8, 8], strides = [1, 1]} : vector<8x16xf32> to vector<8x8xf32>
    %cst_39 = arith.constant 5.000000e-01 : f32
    %75 = vector.broadcast %cst_39 : f32 to vector<8x8xf32>
    %76 = arith.mulf %75, %74 : vector<8x8xf32>
    %77 = math.exp %76 : vector<8x8xf32>
    %78 = arith.mulf %69, %77 : vector<8x8xf32>
    %79 = arith.addf %78, %73 : vector<8x8xf32>
    %80 = tpu.concatenate %79, %73, %74 in 1 : vector<8x8xf32>, vector<8x8xf32>, vector<8x8xf32> -> vector<8x24xf32>
    %c0_40 = arith.constant 0 : index
    %c0_41 = arith.constant 0 : index
    %81 = vector.load %arg12[%c0_40, %c0_41] : memref<8x24xf32, #tpu.memory_space<vmem>>, vector<8x24xf32>
    tpu.vector_store %arg12[%c0_40, %c0_41], %80 {strides = array<i32>} : memref<8x24xf32, #tpu.memory_space<vmem>>, vector<8x24xf32>,
    return
  }
}

</mosaic_0001>

<bundles_post_ra>
// kernel: qzyx_forward.1
= control target key start
LH: loop header
LB: loop body
LE: loop exit
PB: predicated region body
PF: predicated region fallthrough
CT: control target
= control target key end

     0   :  { %19 = vsyncpa [#allocation5], 0  ;;  %s626_s0 = inlined_call_operand.hbm [shape: f32[8,16], index: 0, kind: input, shape index: {}]   ;;  %s627_s1 = inlined_call_operand.vmem [shape: f32[8,4], index: 1, kind: input, shape index: {}]   ;;  %s628_s2 = inlined_call_operand.vmem [shape: f32[16,32], index: 2, kind: input, shape index: {}]   ;;  %s629_s3 = inlined_call_operand.hbm [shape: f32[4,32], index: 3, kind: input, shape index: {}]   ;;  %s630_s4 = inlined_call_operand.hbm [shape: f32[2,32], index: 4, kind: input, shape index: {}]   ;;  %s631_s5 = inlined_call_operand.<no memory space> [shape: f32[1], index: 5, kind: input, shape index: {}]   ;;  %s632_s6 = inlined_call_operand.vmem [shape: f32[32,32], index: 6, kind: input, shape index: {}]   ;;  %s633_s7 = inlined_call_operand.hbm [shape: f32[2,32], index: 7, kind: input, shape index: {}]   ;;  %s634_s8 = inlined_call_operand.<no memory space> [shape: f32[1], index: 8, kind: input, shape index: {}]   ;;  %s635_s9 = inlined_call_operand.vmem [shape: f32[32,16], index: 9, kind: input, shape index: {}]   ;;  %s636_s10 = inlined_call_operand.hbm [shape: f32[1,16], index: 10, kind: input, shape index: {}]   ;;  %s637_s11 = inlined_call_operand.vmem [shape: f32[8,8], index: 11, kind: input, shape index: {}]   ;;  %s638_s12 = inlined_call_operand.vmem [shape: f32[8,24], index: 12, kind: output, shape index: {}]  }
   0x1   :  { %20 = vsyncpa [#allocation7], 0  ;;  %s42_s23 = sshll.u32 %s629_s3, 4  ;;  %s43_s23 = int_to_ptr.hbm [resolvable:$true] %s42_s23 }
   0x2   :  { %21 = vsyncpa [#allocation10], 0  ;;  %s486_s24 = smov [#allocation6]   ;;  %s68_s28 = sshll.u32 %s633_s7, 4  ;;  %s69_s28 = int_to_ptr.hbm [resolvable:$true] %s68_s28 }
   0x3   :  { %s44_s25 = sshll.u32 %s486_s24, 4  ;;  %s487_s29 = smov [#allocation9]   ;;  %s45_s25 = int_to_ptr.vmem [resolvable:$true] %s44_s25 }
   0x4   :  { %47 = dma.hbm_to_vmem [thread:$0]  %s43_s23, 64, %s45_s25, [#allocation7]  }
   0x5   :  { %s70_s30 = sshll.u32 %s487_s29, 4  ;;  %s27_s15 = sshll.u32 %s626_s0, 4  ;;  %s71_s30 = int_to_ptr.vmem [resolvable:$true] %s70_s30  ;;  %s28_s15 = int_to_ptr.hbm [resolvable:$true] %s27_s15 }
   0x6   :  { %73 = dma.hbm_to_vmem [thread:$0]  %s69_s28, 32, %s71_s30, [#allocation10]  }
   0x7   :  { %s53_s17 = sshll.u32 %s630_s4, 4  ;;  %s488_s18 = smov [#allocation4]   ;;  %s54_s17 = int_to_ptr.hbm [resolvable:$true] %s53_s17 }
   0x8   :  { %s29_s19 = sshll.u32 %s488_s18, 4  ;;  %s489_s7 = smov [#allocation8]   ;;  %s30_s19 = int_to_ptr.vmem [resolvable:$true] %s29_s19 }
   0x9   :  { %32 = dma.hbm_to_vmem [thread:$0]  %s28_s15, 128, %s30_s19, [#allocation5]  }
   0xa   :  { %s55_s20 = sshll.u32 %s489_s7, 4  ;;  %s83_s23 = sshll.u32 %s636_s10, 4  ;;  %s56_s20 = int_to_ptr.vmem [resolvable:$true] %s55_s20  ;;  %s84_s23 = int_to_ptr.hbm [resolvable:$true] %s83_s23 }
   0xb   :  { %58 = dma.hbm_to_vmem [thread:$0]  %s54_s17, 32, %s56_s20, [#allocation7]  }
   0xc   :  { %s490_s0 = smov [#allocation11]  }
   0xd   :  { %s85_s24 = sshll.u32 %s490_s0, 4  ;;  %s86_s24 = int_to_ptr.vmem [resolvable:$true] %s85_s24 }
   0xe   :  { %88 = dma.hbm_to_vmem [thread:$0]  %s84_s23, 16, %s86_s24, [#allocation10]  }
   0xf   :  { %480 = dma.done.wait [#allocation5], 128  }
  0x10   :  { %481 = vsyncadd [#allocation5], 4294967168 }
  0x11   :  { %482 = dma.done.wait [#allocation7], 96  }
  0x12   :  { %483 = vsyncadd [#allocation7], 4294967200 }
  0x13   :  { %484 = dma.done.wait [#allocation10], 48  }
  0x14   :  { %485 = vsyncadd [#allocation10], 4294967248  ;;  %vm120_vm0 = vcmask 1043456   ;;  %vm116_vm1 = vcmask 31744   ;;  %v114_v0 = vld [vmem:[%s628_s2 + $0x8] sm:$0xff]  ;;  %v113_v2 = vld [vmem:[%s628_s2] sm:$0xff]  ;;  %v210_v47 = vstv %s631_s5 }
  0x15   :  { %v115_v1 = vld [vmem:[#allocation6] sm:$0xf]  ;;  %162 = vmatpush.msra.mxu1 %v114_v0  ;;  %v112_v3 = vld [vmem:[%s627_s1] sm:$0xff]  ;;  %vm144_vm2 = vcmask 130048   ;;  %vm171_vm3 = vcmask 261120   ;;  %v216_v22 = vld [vmem:[%s632_s6 + $0x18] sm:$0xff] }
  0x16   :  { %341 = vmatpush.msk.msra.mxu0 %vm120_vm0, %v115_v1  ;;  %v111_v4 = vld [vmem:[#allocation4] sm:$0xff]  ;;  %v215_v23 = vld [vmem:[%s632_s6 + $0x10] sm:$0xff]  ;;  %232 = vmatpush.msra.mxu2 %v216_v22  ;;  %v214_v26 = vld [vmem:[%s632_s6 + $0x8] sm:$0xff]  ;;  %s491_s0 = smov 120   ;;  %s492_s24 = smov 8   ;;  %vm329_vm12 = vcmask 64512  }
  0x17   :  { %342 = vmatmul.msk.f32.vlgmr.msra.gmra.mxu0 %vm116_vm1, %v112_v3  ;;  %163 = vmatpush.msra.mxu1 %v113_v2  ;;  %v213_v29 = vld [vmem:[%s632_s6] sm:$0xff]  ;;  %v168_v37 = vld [vmem:[#allocation8] sm:$0x1]  ;;  %v169_v41 = vld [vmem:[#allocation8 + $0x1] sm:$0x1]  ;;  %vm332_vm13 = vcmask 195584  }
  0x18   :  { %343 = vmatmul.msk.f32.vlgmr.msra.gmra.mxu1 %vm144_vm2, %v111_v4  ;;  %233 = vmatpush.msra.mxu2 %v215_v23  ;;  %v287_v2 = vld [vmem:[%s635_s9 + $0x18] sm:$0xff] }
  0x19   :  { %308 = vmatpush.msra.mxu3 %v287_v2 }
  0x1a   :  { %234 = vmatpush.msra.mxu2 %v214_v26 }
  0x1c   :  { %235 = vmatpush.msra.mxu2 %v213_v29 }
  0x94   :  { %v141_v5 = vpop.f32.mrf.mxu0 }
  0x95   :  { %v165_v6 = vpop.f32.mrf.mxu1 }
  0x96   :  { %v166_v7 = vadd.f32 %v165_v6, %v141_v5  ;;  %v286_v5 = vld [vmem:[%s635_s9 + $0x10] sm:$0xff] }
  0x97   :  { %309 = vmatpush.msra.mxu3 %v286_v5 }
  0x98   :  { %v172_v8 = vsel %vm171_vm3, %v166_v7, 0.0  ;;  %v179_v9 = vmul.f32 %v166_v7, %v166_v7 }
  0x99   :  { %v173_v10 = vrot.slane %v172_v8, 4 }
  0x9a   :  { %v180_v11 = vsel %vm171_vm3, %v179_v9, 0.0  ;;  %v284_v9 = vld [vmem:[%s635_s9] sm:$0xff] }
  0x9b   :  { %v174_v12 = vadd.f32 %v173_v10, %v172_v8  ;;  %v181_v13 = vrot.slane %v180_v11, 4  ;;  %v285_v8 = vld [vmem:[%s635_s9 + $0x8] sm:$0xff] }
  0x9c   :  { %310 = vmatpush.msra.mxu3 %v285_v8 }
  0x9d   :  { %v175_v14 = vrot.slane %v174_v12, 2  ;;  %v182_v15 = vadd.f32 %v181_v13, %v180_v11 }
  0x9e   :  { %311 = vmatpush.msra.mxu3 %v284_v9 }
  0x9f   :  { %v176_v16 = vadd.f32 %v175_v14, %v174_v12  ;;  %v183_v17 = vrot.slane %v182_v15, 2 }
  0xa1   :  { %v177_v18 = vrot.slane %v176_v16, 1  ;;  %v184_v19 = vadd.f32 %v183_v17, %v182_v15  ;;  %v240_v17 = vld [vmem:[#allocation9] sm:$0x1] }
  0xa3   :  { %v178_v20 = vadd.f32 %v177_v18, %v176_v16  ;;  %v185_v21 = vrot.slane %v184_v19, 1 }
  0xa5   :  { %v186_v24 = vadd.f32 %v185_v21, %v184_v19  ;;  %v187_v25 = vmul.f32 0.125, %v178_v20  ;;  %v241_v21 = vld [vmem:[#allocation9 + $0x1] sm:$0x1] }
  0xa7   :  { %v188_v27 = vmul.f32 0.125, %v186_v24  ;;  %v189_v28 = vmul.f32 %v187_v25, %v187_v25 }
  0xa9   :  { %v190_v30 = vsub.f32 %v188_v27, %v189_v28  ;;  %v281_v27 = vstv %s634_s8 }
  0xab   :  { %v191_v31 = vadd.f32 1e-05, %v190_v30 }
  0xad   :  { %354 = vrsqrt.f32 %v191_v31  ;;  %vm198_vm5 = vweird.f32 %v191_v31 }
  0xb3   :  { %v355_v32 = vpop.eup %354 }
  0xb4   :  { %v193_v33 = vmul.f32 %v355_v32, %v191_v31  ;;  %vm199_vm4 = vweird.f32 %v355_v32  ;;  %v353_v31 = vld [vmem:[#allocation11] ss:$0 sm:$0xff] }
  0xb5   :  { %vm200_vm6 = vmor %vm198_vm5, %vm199_vm4 }
  0xb6   :  { %v194_v34 = vmul.f32 %v355_v32, %v193_v33 }
  0xb8   :  { %v195_v35 = vmul.f32 0.5, %v194_v34 }
  0xba   :  { %v196_v36 = vsub.f32 1.5, %v195_v35 }
  0xbc   :  { %v197_v38 = vmul.f32 %v355_v32, %v196_v36 }
  0xbe   :  { %v201_v39 = vsel %vm200_vm6, %v355_v32, %v197_v38 }
  0xbf   :  { %v202_v40 = vmul.f32 %v201_v39, %v168_v37  ;;  %v289_v37 = vld [vmem:[%s637_s11] sm:$0xff] }
  0xc1   :  { %v205_v42 = vperm.slane %v202_v40, 0  ;;  %v203_v43 = vmul.f32 %v202_v40, %v187_v25 }
  0xc3   :  { %v204_v44 = vsub.f32 %v169_v41, %v203_v43  ;;  %v206_v45 = vmul.f32 %v205_v42, %v166_v7 }
  0xc5   :  { %v207_v46 = vperm.slane %v204_v44, 0 }
  0xc7   :  { %v208_v48 = vadd.f32 %v207_v46, %v206_v45 }
  0xc9   :  { %vm209_vm7 = vcmp.ge.f32.partialorder %v208_v48, 0.0  ;;  %v211_v49 = vmul.f32 %v210_v47, %v208_v48 }
  0xcb   :  { %v212_v50 = vsel %vm209_vm7, %v208_v48, %v211_v49 }
  0xcc   :  { %344 = vmatmul.msk.f32.vlgmr.msra.gmra.mxu2 %vm171_vm3, %v212_v50 }
 0x14f   :  { %v237_v51 = vpop.f32.mrf.mxu2 }
 0x150   :  { %v243_v52 = vsel %vm171_vm3, %v237_v51, 0.0  ;;  %v250_v53 = vmul.f32 %v237_v51, %v237_v51 }
 0x151   :  { %v244_v54 = vrot.slane %v243_v52, 4 }
 0x152   :  { %v251_v55 = vsel %vm171_vm3, %v250_v53, 0.0 }
 0x153   :  { %v245_v56 = vadd.f32 %v244_v54, %v243_v52  ;;  %v252_v57 = vrot.slane %v251_v55, 4 }
 0x155   :  { %v246_v58 = vrot.slane %v245_v56, 2  ;;  %v253_v59 = vadd.f32 %v252_v57, %v251_v55 }
 0x157   :  { %v247_v60 = vadd.f32 %v246_v58, %v245_v56  ;;  %v254_v61 = vrot.slane %v253_v59, 2 }
 0x159   :  { %v248_v62 = vrot.slane %v247_v60, 1  ;;  %v255_v63 = vadd.f32 %v254_v61, %v253_v59 }
 0x15b   :  { %v249_v0 = vadd.f32 %v248_v62, %v247_v60  ;;  %v256_v1 = vrot.slane %v255_v63, 1 }
 0x15d   :  { %v257_v3 = vadd.f32 %v256_v1, %v255_v63  ;;  %v258_v4 = vmul.f32 0.125, %v249_v0 }
 0x15f   :  { %v259_v6 = vmul.f32 0.125, %v257_v3  ;;  %v260_v7 = vmul.f32 %v258_v4, %v258_v4 }
 0x161   :  { %v261_v10 = vsub.f32 %v259_v6, %v260_v7 }
 0x163   :  { %v262_v11 = vadd.f32 1e-05, %v261_v10 }
 0x165   :  { %356 = vrsqrt.f32 %v262_v11  ;;  %vm269_vm9 = vweird.f32 %v262_v11 }
 0x16b   :  { %v357_v12 = vpop.eup %356 }
 0x16c   :  { %v264_v13 = vmul.f32 %v357_v12, %v262_v11  ;;  %vm270_vm8 = vweird.f32 %v357_v12 }
 0x16d   :  { %vm271_vm10 = vmor %vm269_vm9, %vm270_vm8 }
 0x16e   :  { %v265_v14 = vmul.f32 %v357_v12, %v264_v13 }
 0x170   :  { %v266_v15 = vmul.f32 0.5, %v265_v14 }
 0x172   :  { %v267_v16 = vsub.f32 1.5, %v266_v15 }
 0x174   :  { %v268_v18 = vmul.f32 %v357_v12, %v267_v16 }
 0x176   :  { %v272_v19 = vsel %vm271_vm10, %v357_v12, %v268_v18 }
 0x177   :  { %v273_v20 = vmul.f32 %v272_v19, %v240_v17 }
 0x179   :  { %v274_v22 = vmul.f32 %v273_v20, %v258_v4  ;;  %v276_v23 = vperm.slane %v273_v20, 0 }
 0x17b   :  { %v275_v24 = vsub.f32 %v241_v21, %v274_v22  ;;  %v277_v25 = vmul.f32 %v276_v23, %v237_v51 }
 0x17d   :  { %v278_v26 = vperm.slane %v275_v24, 0 }
 0x17f   :  { %v279_v28 = vadd.f32 %v278_v26, %v277_v25 }
 0x181   :  { %vm280_vm11 = vcmp.ge.f32.partialorder %v279_v28, 0.0  ;;  %v282_v29 = vmul.f32 %v281_v27, %v279_v28 }
 0x183   :  { %v283_v30 = vsel %vm280_vm11, %v279_v28, %v282_v29 }
 0x184   :  { %345 = vmatmul.msk.f32.vlgmr.msra.gmra.mxu3 %vm171_vm3, %v283_v30 }
 0x207   :  { %v313_v32 = vpop.f32.mrf.mxu3 }
 0x208   :  { %v314_v33 = vadd.f32 %v353_v31, %v313_v32 }
 0x20a   :  { %v316_v34 = vmul.f32 0.5, %v314_v33 }
 0x20c   :  { %v317_v35 = vmul.f32 1.442695, %v316_v34 }
 0x20e   :  { %358 = vpow2.f32 %v317_v35 }
 0x214   :  { %v359_v36 = vpop.eup %358 }
 0x215   :  { %320 = vrot.lane.b32.xlu0 %v359_v36, %s491_s0 }
 0x21d   :  { %326 = vrot.lane.b32.xlu0 %v314_v33, %s492_s24 }
 0x287   :  { %v321_v38 = vpop.permute.xlu0 %320 }
 0x288   :  { %v323_v39 = vmul.f32 %v321_v38, %v289_v37 }
 0x28a   :  { %v324_v40 = vadd.f32 %v323_v39, %v314_v33 }
 0x28f   :  { %v327_v41 = vpop.permute.xlu0 %326 }
 0x290   :  { %v330_v42 = vsel %vm329_vm12, %v324_v40, %v327_v41 }
 0x291   :  { %v331_v43 = vsel %vm144_vm2, %v330_v42, %v327_v41 }
 0x292   :  { %333 = vst.msk [vmem:[%s638_s12] sm:$0xff] %vm332_vm13, %v331_v43 }
 0x293   :  { %338 = vsyncpa [#allocation5], 1 }
 0x294   :  { %339 = vsyncpa [#allocation7], 1 }
 0x295   :  { %340 = vsyncpa [#allocation10], 1 }

</bundles_post_ra>
